<compile_context>
chip_gen: v5e
topology: v5e:2x2
jax: 0.10.0
libtpu: 0.0.40
codegen_flags: <defaults>
</compile_context>

<pallas_src>
import functools

import jax
import jax.numpy as jnp
from jax.experimental import pallas as pl
from jax.experimental.pallas import tpu as pltpu


# ---------------------------------------------------------------------------
# Kernel
# ---------------------------------------------------------------------------
def _linear_block_kernel(x_ref, w_ref, b_ref, o_ref, acc_ref, *, use_relu: bool):
    # grid = (M tiles, N tiles, K tiles); K is the reduction axis (last, "arbitrary").
    @pl.when(pl.program_id(2) == 0)
    def _():
        acc_ref[...] = jnp.zeros_like(acc_ref)

    acc_ref[...] += jnp.dot(x_ref[...], w_ref[...],
                            preferred_element_type=jnp.float32)

    @pl.when(pl.program_id(2) == pl.num_programs(2) - 1)
    def _():
        y = acc_ref[...] + b_ref[...]          # bias (and folded BN) broadcast over rows
        if use_relu:
            y = jnp.maximum(y, 0.0)
        # TODO(synk): training-mode dropout (p>0) would use pltpu.prng_seed /
        # pltpu.prng_random_bits here; p_dropout=0.0 (inference) is an identity.
        o_ref[...] = y.astype(o_ref.dtype)


# ---------------------------------------------------------------------------
# Parameter preparation (done ONCE, outside the per-step forward path)
# ---------------------------------------------------------------------------
def _round_up(x, m):
    return (x + m - 1) // m * m


def prepare_linear_block_params(weight, bias=None, *, bn_gamma=None, bn_beta=None,
                                bn_mean=None, bn_var=None, bn_eps=1e-5):
    """weight: [out, in] (PyTorch layout). Returns (w_t [in, N_pad], bias2d [1, N_pad], n_out).

    Eval-mode BatchNorm1d (if given) is folded into the weight/bias:
      bn(y) = y*scale + shift, scale = gamma/sqrt(var+eps), shift = beta - mean*scale
      => W' = W * scale[:, None],  b' = b*scale + shift
    """
    n_out, k_in = weight.shape
    w = weight
    b = bias if bias is not None else jnp.zeros((n_out,), weight.dtype)
    if bn_gamma is not None:
        scale = bn_gamma / jnp.sqrt(bn_var + bn_eps)
        shift = bn_beta - bn_mean * scale
        w = w * scale[:, None]
        b = b * scale + shift

    n_pad = max(_round_up(n_out, 128), 128)          # lane-dense output columns
    w_t = jnp.pad(w.T, ((0, 0), (0, n_pad - n_out)))                 # [K, N_pad]
    b2d = jnp.pad(b, (0, n_pad - n_out)).reshape(1, n_pad)
    return w_t, b2d.astype(jnp.float32), n_out


# ---------------------------------------------------------------------------
# Tile selection — VMEM-aware, (8,128)-legal, sized for the smallest VMEM (v7x 64 MiB)
# ---------------------------------------------------------------------------
def _default_tiles(B, K, Np):
    tm = B if B <= 256 else 256           # 256 % 8 == 0; partial last M block is fine
    tn = Np if Np <= 512 else 512         # Np is a multiple of 128
    if K <= 1024:
        tk = K                             # full-extent K: no reduction tiling needed
    else:
        tk = 1024
        while tk > 0 and K % tk != 0:      # require K % tk == 0 (no garbage in reduction)
            tk -= 128
        if tk == 0:
            tk = K
    return tm, tn, tk


# ---------------------------------------------------------------------------
# Forward wrapper
# ---------------------------------------------------------------------------
def linear_block(x, w_t, b2d, *, n_out, use_relu=False, compute_dtype=None,
                 tm=None, tn=None, tk=None):
    """x: [B, K]; w_t: [K, N_pad] (pre-transposed, padded); b2d: [1, N_pad] f32."""
    B, K = x.shape
    K2, Np = w_t.shape
    assert K == K2, f"in_features mismatch: x has {K}, weight has {K2}"
    assert Np % 128 == 0, "weight must be padded to a multiple of 128 output columns"

    out_dtype = x.dtype
    if compute_dtype is not None:          # bf16 MXU inputs (v6e/v7x), f32 accumulation
        x = x.astype(compute_dtype)
        w_t = w_t.astype(compute_dtype)

    tm_d, tn_d, tk_d = _default_tiles(B, K, Np)
    tm = tm or tm_d
    tn = tn or tn_d
    tk = tk or tk_d

    # (8,128) legality guards: last-two block dims must be multiples of (8,128)
    # or equal to the full array extent.
    assert tm == B or tm % 8 == 0, f"tm={tm} must be a multiple of 8 or equal B={B}"
    assert tn == Np or tn % 128 == 0, f"tn={tn} must be a multiple of 128 or equal N_pad={Np}"
    assert tk == K or (tk % 128 == 0 and K % tk == 0), \
        f"tk={tk} must divide K={K} and be a multiple of 128 (or equal K)"

    grid = (pl.cdiv(B, tm), pl.cdiv(Np, tn), pl.cdiv(K, tk))
    # NOTE(v7x): for large B or N the defaults give >=2 blocks on a "parallel"
    # axis so both TensorCores get work; tiny problems collapse to grid=(1,1,1).

    in_bytes = jnp.dtype(x.dtype).itemsize
    out_bytes = jnp.dtype(out_dtype).itemsize
    vmem_needed = (2 * (tm * tk * in_bytes + tk * tn * in_bytes + tn * 4)   # double-buffered inputs
                   + 2 * tm * tn * out_bytes                                # double-buffered output
                   + tm * tn * 4)                                           # f32 accumulator
    vmem_limit = None
    if vmem_needed > 32 * 1024 * 1024:     # only raise the scoped limit when needed
        vmem_limit = int(min(vmem_needed * 5 // 4, 60 * 1024 * 1024))

    cost = pl.CostEstimate(
        flops=2 * B * K * Np,
        transcendentals=0,
        bytes_accessed=(B * K * in_bytes + K * Np * in_bytes + Np * 4 + B * Np * out_bytes),
    )

    kernel = functools.partial(_linear_block_kernel, use_relu=use_relu)

    out_padded = pl.pallas_call(
        kernel,
        out_shape=jax.ShapeDtypeStruct((B, Np), out_dtype),
        grid_spec=pltpu.PrefetchScalarGridSpec(
            num_scalar_prefetch=0,
            grid=grid,
            in_specs=[
                pl.BlockSpec((tm, tk), lambda i, j, k: (i, k)),   # x tile
                pl.BlockSpec((tk, tn), lambda i, j, k: (k, j)),   # W^T tile
                pl.BlockSpec((1, tn), lambda i, j, k: (0, j)),    # bias (+ folded BN)
            ],
            out_specs=pl.BlockSpec((tm, tn), lambda i, j, k: (i, j)),
            scratch_shapes=[pltpu.VMEM((tm, tn), jnp.float32)],
        ),
        compiler_params=pltpu.CompilerParams(
            dimension_semantics=("parallel", "parallel", "arbitrary"),
            vmem_limit_bytes=vmem_limit),
        cost_estimate=cost,
    )(x, w_t, b2d)

    return out_padded[:, :n_out]           # slice padded lanes back to out_features


# ---------------------------------------------------------------------------
# Example / self-test
# ---------------------------------------------------------------------------
if __name__ == "__main__":
    # LinearBlock(in_features=32, out_features=64) — defaults:
    #   act_func=None (Identity), bias=True, use_batch_norm=False, p_dropout=0.0
    B, IN, OUT = 8, 32, 64

    key = jax.random.PRNGKey(0)
    kx, kw, kb, kg, kbt, km, kv = jax.random.split(key, 7)

    x = jax.random.normal(kx, (B, IN), dtype=jnp.float32)
    bound = 1.0 / (IN ** 0.5)
    weight = jax.random.uniform(kw, (OUT, IN), jnp.float32, -bound, bound)
    bias = jax.random.uniform(kb, (OUT,), jnp.float32, -bound, bound)

    fwd = jax.jit(linear_block,
                  static_argnames=("n_out", "use_relu", "compute_dtype", "tm", "tn", "tk"))

    # 1) default LinearBlock: Linear + Identity act + no BN + dropout(0)
    w_t, b2d, n_out = prepare_linear_block_params(weight, bias)
    out = jax.block_until_ready(fwd(x, w_t, b2d, n_out=n_out, use_relu=False))
    ref = x @ weight.T + bias
    assert out.shape == (B, OUT)
    assert jnp.allclose(out, ref, atol=1e-5, rtol=1e-5), "mismatch vs reference (plain)"

    # 2) eval-mode BatchNorm1d folded into W/b + ReLU activation
    gamma = jax.random.uniform(kg, (OUT,), jnp.float32, 0.5, 1.5)
    beta = 0.1 * jax.random.normal(kbt, (OUT,), jnp.float32)
    mean = 0.1 * jax.random.normal(km, (OUT,), jnp.float32)
    var = jax.random.uniform(kv, (OUT,), jnp.float32, 0.5, 1.5)
    w_t2, b2d2, _ = prepare_linear_block_params(
        weight, bias, bn_gamma=gamma, bn_beta=beta, bn_mean=mean, bn_var=var)
    out2 = jax.block_until_ready(fwd(x, w_t2, b2d2, n_out=OUT, use_relu=True))
    y = x @ weight.T + bias
    y = (y - mean) / jnp.sqrt(var + 1e-5) * gamma + beta
    ref2 = jnp.maximum(y, 0.0)
    assert jnp.allclose(out2, ref2, atol=1e-4, rtol=1e-4), "mismatch vs reference (BN+ReLU)"

    # 3) bf16 MXU inputs (v6e/v7x recipe), f32 accumulation
    out3 = jax.block_until_ready(
        fwd(x, w_t, b2d, n_out=n_out, compute_dtype=jnp.bfloat16))
    assert jnp.allclose(out3, ref, atol=5e-2, rtol=5e-2), "mismatch vs reference (bf16)"

    print("KERNEL_OK")
</pallas_src>

<mosaic_0001>
module attributes {stable_mosaic.version = 11 : i64} {
  func.func @_linear_block_kernel(%arg0: i32, %arg1: i32, %arg2: i32, %arg3: memref<8x32xf32, #tpu.memory_space<vmem>>, %arg4: memref<32x128xf32, #tpu.memory_space<vmem>>, %arg5: memref<1x128xf32, #tpu.memory_space<vmem>>, %arg6: memref<8x128xf32, #tpu.memory_space<vmem>>, %arg7: memref<8x128xf32, #tpu.memory_space<vmem>>) attributes {dimension_semantics = [#tpu.dimension_semantics<parallel>, #tpu.dimension_semantics<parallel>, #tpu.dimension_semantics<arbitrary>], iteration_bounds = array<i64: 1, 1, 1>, scalar_prefetch = 0 : i64, scratch_operands = 1 : i64, tpu.core_type = #tpu.core_type<tc>, window_params = [{transform_indices = @transform_0, window_bounds = array<i64: 8, 32>}, {transform_indices = @transform_1, window_bounds = array<i64: 32, 128>}, {transform_indices = @transform_2, window_bounds = array<i64: 1, 128>}, {transform_indices = @transform_3, window_bounds = array<i64: 8, 128>}]} {
    %c0_i32 = arith.constant 0 : i32
    %0 = arith.cmpi eq, %arg2, %c0_i32 : i32
    %1 = arith.extui %0 : i1 to i32
    %c0_i32_0 = arith.constant 0 : i32
    %2 = arith.cmpi ne, %1, %c0_i32_0 : i32
    scf.if %2 {
      %cst_10 = arith.constant 0.000000e+00 : f32
      %12 = vector.broadcast %cst_10 : f32 to vector<8x128xf32>
      %c0_11 = arith.constant 0 : index
      %c0_12 = arith.constant 0 : index
      %13 = vector.load %arg7[%c0_11, %c0_12] : memref<8x128xf32, #tpu.memory_space<vmem>>, vector<8x128xf32>
      tpu.vector_store %arg7[%c0_11, %c0_12], %12 {strides = array<i32>} : memref<8x128xf32, #tpu.memory_space<vmem>>, vector<8x128xf32>,
    } else {
    }
    %c0 = arith.constant 0 : index
    %c0_1 = arith.constant 0 : index
    %3 = vector.load %arg7[%c0, %c0_1] : memref<8x128xf32, #tpu.memory_space<vmem>>, vector<8x128xf32>
    %c0_2 = arith.constant 0 : index
    %c0_3 = arith.constant 0 : index
    %4 = vector.load %arg3[%c0_2, %c0_3] : memref<8x32xf32, #tpu.memory_space<vmem>>, vector<8x32xf32>
    %c0_4 = arith.constant 0 : index
    %c0_5 = arith.constant 0 : index
    %5 = vector.load %arg4[%c0_4, %c0_5] : memref<32x128xf32, #tpu.memory_space<vmem>>, vector<32x128xf32>
    %cst = arith.constant dense<0.000000e+00> : vector<8x128xf32>
    %6 = tpu.matmul %4, %5, %cst {dimension_numbers = #tpu.dot_dimension_numbers<[1], [0], [0], [1], [0, 0, 1, 1], [], []>} : vector<8x32xf32>, vector<32x128xf32>, vector<8x128xf32> -> vector<8x128xf32>
    %7 = arith.addf %3, %6 : vector<8x128xf32>
    %c0_6 = arith.constant 0 : index
    %c0_7 = arith.constant 0 : index
    %8 = vector.load %arg7[%c0_6, %c0_7] : memref<8x128xf32, #tpu.memory_space<vmem>>, vector<8x128xf32>
    tpu.vector_store %arg7[%c0_6, %c0_7], %7 {strides = array<i32>} : memref<8x128xf32, #tpu.memory_space<vmem>>, vector<8x128xf32>,
    %c0_i32_8 = arith.constant 0 : i32
    %9 = arith.cmpi eq, %arg2, %c0_i32_8 : i32
    %10 = arith.extui %9 : i1 to i32
    %c0_i32_9 = arith.constant 0 : i32
    %11 = arith.cmpi ne, %10, %c0_i32_9 : i32
    scf.if %11 {
      %c0_10 = arith.constant 0 : index
      %c0_11 = arith.constant 0 : index
      %12 = vector.load %arg7[%c0_10, %c0_11] : memref<8x128xf32, #tpu.memory_space<vmem>>, vector<8x128xf32>
      %c0_12 = arith.constant 0 : index
      %c0_13 = arith.constant 0 : index
      %13 = vector.load %arg5[%c0_12, %c0_13] : memref<1x128xf32, #tpu.memory_space<vmem>>, vector<1x128xf32>
      %14 = vector.broadcast %13 : vector<1x128xf32> to vector<8x128xf32>
      %15 = arith.addf %12, %14 : vector<8x128xf32>
      %c0_14 = arith.constant 0 : index
      %c0_15 = arith.constant 0 : index
      %16 = vector.load %arg6[%c0_14, %c0_15] : memref<8x128xf32, #tpu.memory_space<vmem>>, vector<8x128xf32>
      tpu.vector_store %arg6[%c0_14, %c0_15], %15 {strides = array<i32>} : memref<8x128xf32, #tpu.memory_space<vmem>>, vector<8x128xf32>,
    } else {
    }
    return
  }
  func.func @transform_0(%arg0: i32, %arg1: i32, %arg2: i32) -> (i32, i32) {
    %c0_i32 = arith.constant 0 : i32
    return %arg0, %arg2 : i32, i32
  }
  func.func @transform_1(%arg0: i32, %arg1: i32, %arg2: i32) -> (i32, i32) {
    %c0_i32 = arith.constant 0 : i32
    return %arg2, %arg1 : i32, i32
  }
  func.func @transform_2(%arg0: i32, %arg1: i32, %arg2: i32) -> (i32, i32) {
    %c0_i32 = arith.constant 0 : i32
    %c0_i32_0 = arith.constant 0 : i32
    return %c0_i32, %arg1 : i32, i32
  }
  func.func @transform_3(%arg0: i32, %arg1: i32, %arg2: i32) -> (i32, i32) {
    %c0_i32 = arith.constant 0 : i32
    return %arg0, %arg1 : i32, i32
  }
}

</mosaic_0001>

<bundles_post_ra>
// kernel: linear_block.1
= control target key start
LH: loop header
LB: loop body
LE: loop exit
PB: predicated region body
PF: predicated region fallthrough
CT: control target
= control target key end

     0   :  { %8 = vsyncpa [#allocation4], 0  ;;  %s232_s0 = inlined_call_operand.hbm [shape: f32[8,32], index: 0, kind: input, shape index: {}]   ;;  %s233_s1 = inlined_call_operand.hbm [shape: f32[32,128], index: 1, kind: input, shape index: {}]   ;;  %s234_s2 = inlined_call_operand.vmem [shape: f32[1,128], index: 2, kind: input, shape index: {}]   ;;  %s235_s3 = inlined_call_operand.hbm [shape: f32[8,128], index: 3, kind: output, shape index: {}]  }
   0x1   :  { %9 = vsyncpa [#allocation7], 0 }
   0x2   :  { %10 = vsyncpa [#allocation5], 0  ;;  %s16_s14 = sshll.u32 %s232_s0, 4  ;;  %s195_s15 = smov [#allocation3]   ;;  %s17_s14 = int_to_ptr.hbm [resolvable:$true] %s16_s14 }
   0x3   :  { %s18_s16 = sshll.u32 %s195_s15, 4  ;;  %s26_s19 = sshll.u32 %s233_s1, 4  ;;  %s19_s16 = int_to_ptr.vmem [resolvable:$true] %s18_s16  ;;  %s27_s19 = int_to_ptr.hbm [resolvable:$true] %s26_s19 }
   0x4   :  { %21 = dma.hbm_to_vmem [thread:$0]  %s17_s14, 128, %s19_s16, [#allocation4]  }
   0x5   :  { %s196_s20 = smov [#allocation6]   ;;  %s197_s22 = smov 128  }
   0x6   :  { %s28_s21 = sshll.u32 %s196_s20, 4  ;;  %s198_s23 = smov 8   ;;  %s29_s21 = int_to_ptr.vmem [resolvable:$true] %s28_s21 }
   0x7   :  { %34 = dma.hbm_to_vmem [thread:$0]  %s27_s19, 512, %s29_s21, [#allocation7], %s197_s22, %s197_s22, %s198_s23  }
   0x8   :  { %189 = dma.done.wait [#allocation4], 128  }
   0x9   :  { %190 = vsyncadd [#allocation4], 4294967168 }
   0xa   :  { %191 = dma.done.wait [#allocation7], 512  }
   0xb   :  { %192 = vsyncadd [#allocation7], 4294966784  ;;  %v55_v0 = vld [vmem:[#allocation6 + $0x18] sm:$0xff]  ;;  %v54_v1 = vld [vmem:[#allocation6 + $0x10] sm:$0xff]  ;;  %vm56_vm0 = vcmask 261120   ;;  %s199_s24 = smov [#allocation8]  }
   0xc   :  { %72 = vmatpush.msra.mxu0 %v55_v0  ;;  %v53_v2 = vld [vmem:[#allocation6 + $0x8] sm:$0xff]  ;;  %v52_v3 = vld [vmem:[#allocation6] sm:$0xff]  ;;  %v51_v4 = vld [vmem:[#allocation3] sm:$0xff]  ;;  %s97_s25 = sshll.u32 %s199_s24, 4  ;;  %s99_s28 = sshll.u32 %s235_s3, 4  ;;  %s98_s25 = int_to_ptr.vmem [resolvable:$true] %s97_s25  ;;  %s100_s28 = int_to_ptr.hbm [resolvable:$true] %s99_s28 }
   0xd   :  { %v116_v5 = vld [vmem:[%s234_s2] ss:$0 sm:$0xff] }
   0xe   :  { %73 = vmatpush.msra.mxu0 %v54_v1 }
  0x10   :  { %74 = vmatpush.msra.mxu0 %v53_v2 }
  0x12   :  { %75 = vmatpush.msra.mxu0 %v52_v3 }
  0x13   :  { %110 = vmatmul.msk.f32.vlgmr.msra.gmra.mxu0 %vm56_vm0, %v51_v4 }
  0x90   :  { %v77_v6 = vpop.f32.mrf.mxu0 }
  0x91   :  { %v90_v7 = vadd.f32 %v116_v5, %v77_v6 }
  0x93   :  { %91 = vst [vmem:[#allocation8] sm:$0xff] %v90_v7 }
  0x94   :  { %102 = dma.vmem_to_hbm [thread:$0]  %s98_s25, 128, %s100_s28, [#allocation5]  }
  0x95   :  { %193 = dma.done.wait [#allocation5], 128  }
  0x96   :  { %194 = vsyncadd [#allocation5], 4294967168 }
  0x97   :  { %107 = vsyncpa [#allocation4], 1 }
  0x98   :  { %108 = vsyncpa [#allocation7], 1 }
  0x99   :  { %109 = vsyncpa [#allocation5], 1 }

</bundles_post_ra>
